<compile_context>
chip_gen: v7x
topology: tpu7x:2x2x1
jax: 0.10.0
libtpu: 0.0.40
codegen_flags: <defaults>
</compile_context>

<pallas_src>
import functools

import jax
import jax.numpy as jnp
from jax.experimental import pallas as pl
from jax.experimental.pallas import tpu as pltpu  # noqa: F401 (TPU backend)

LANE = 128


# ----------------------------- Pallas kernel ------------------------------- #

def _net1_fused_kernel(a_ref, x_ref, w_ref, b_ref, wz_ref, bz_ref,
                       z_ref, h_ref):
    """Fused forward: L x (GCN + ReLU) + final Linear, all in VMEM.

    a_ref : [N, N]           normalized adjacency
    x_ref : [N, D]           node features, D = padded feature/hidden dim (128)
    w_ref : [L, D, D]        stacked (zero-padded) GCN weights
    b_ref : [L, 1, D]        stacked (zero-padded) GCN biases
    wz_ref: [D, C]           final linear weight (C = padded class dim, 128)
    bz_ref: [1, C]           final linear bias
    z_ref : [N, C]  output   logits (padded)
    h_ref : [N, D]  output   last hidden activation (padded)
    """
    num_layers = w_ref.shape[0]            # static at trace time
    a = a_ref[...]
    h = x_ref[...]
    # Static Python loop over layers: activation stays resident on-chip,
    # no HBM writeback/reload between layers.
    for l in range(num_layers):
        # (A @ X) @ W ordering -- cheaper N^2 term when f_in <= f_out.
        ah = jnp.dot(a, h, preferred_element_type=jnp.float32)
        h = jnp.dot(ah, w_ref[l], preferred_element_type=jnp.float32) + b_ref[l]
        h = jnp.maximum(h, 0.0)
        # dropout(training=False) == identity
    h_ref[...] = h.astype(h_ref.dtype)
    z = jnp.dot(h, wz_ref[...], preferred_element_type=jnp.float32) + bz_ref[...]
    z_ref[...] = z.astype(z_ref.dtype)


def _full(shape):
    # Whole-array block (allowed because block dims equal the array dims).
    return pl.BlockSpec(shape, lambda: tuple(0 for _ in shape))


# ------------------------------- model glue -------------------------------- #

def _round_up(x, m):
    return ((x + m - 1) // m) * m


def _pad2(a, rows, cols):
    return jnp.pad(a, ((0, rows - a.shape[0]), (0, cols - a.shape[1])))


def build_normalized_adjacency(edge_index, num_nodes):
    """Dense A_hat = D^{-1/2} (A + I) D^{-1/2} from a [2, E] edge_index."""
    src, dst = edge_index[0], edge_index[1]
    a = jnp.zeros((num_nodes, num_nodes), jnp.float32)
    a = a.at[dst, src].set(1.0)                       # messages flow src -> dst
    a = a + jnp.eye(num_nodes, dtype=jnp.float32)     # add self-loops
    deg = jnp.sum(a, axis=1)
    dinv_sqrt = jnp.where(deg > 0, 1.0 / jnp.sqrt(deg), 0.0)
    return dinv_sqrt[:, None] * a * dinv_sqrt[None, :]


def init_params(key, num_features, hidden, num_classes, num_layers):
    params = {"conv": [], "lt1": None}
    dims = [num_features] + [hidden] * num_layers
    for i in range(num_layers):
        key, kw = jax.random.split(key)
        fan_in, fan_out = dims[i], dims[i + 1]
        limit = jnp.sqrt(6.0 / (fan_in + fan_out))        # glorot (PyG default)
        w = jax.random.uniform(kw, (fan_in, fan_out), jnp.float32, -limit, limit)
        b = jnp.zeros((fan_out,), jnp.float32)
        params["conv"].append((w, b))
    key, kw, kb = jax.random.split(key, 3)
    limit = 1.0 / jnp.sqrt(hidden)                        # torch.nn.Linear default
    w = jax.random.uniform(kw, (hidden, num_classes), jnp.float32, -limit, limit)
    b = jax.random.uniform(kb, (num_classes,), jnp.float32, -limit, limit)
    params["lt1"] = (w, b)
    return params


def pack_params(params):
    """Zero-pad feature dims to the 128-lane width and stack per-layer weights.

    Done once, outside the jitted forward, so the hot path is a single
    pallas_call.  Zero padding is exact: padded columns stay zero through
    matmul + bias + ReLU and are stripped after the kernel.
    """
    conv = params["conv"]
    wz, bz = params["lt1"]
    num_features = conv[0][0].shape[0]
    hidden = conv[0][0].shape[1]
    num_classes = wz.shape[1]
    d_pad = _round_up(max(num_features, hidden), LANE)
    c_pad = _round_up(num_classes, LANE)

    w_stack = jnp.stack([_pad2(w, d_pad, d_pad) for (w, _) in conv])
    b_stack = jnp.stack([_pad2(b.reshape(1, -1), 1, d_pad) for (_, b) in conv])
    wz_p = _pad2(wz, d_pad, c_pad)
    bz_p = _pad2(bz.reshape(1, -1), 1, c_pad)
    packed = {"w": w_stack, "b": b_stack, "wz": wz_p, "bz": bz_p}
    return packed, hidden, num_classes


@functools.partial(jax.jit, static_argnames=("hidden", "num_classes"))
def net1_forward(packed, x, a_hat, *, hidden, num_classes):
    n, f_in = x.shape
    num_layers, d_pad, _ = packed["w"].shape
    c_pad = packed["wz"].shape[1]

    x_p = _pad2(x, n, d_pad)

    z_p, h_p = pl.pallas_call(
        _net1_fused_kernel,
        out_shape=(
            jax.ShapeDtypeStruct((n, c_pad), jnp.float32),   # logits (padded)
            jax.ShapeDtypeStruct((n, d_pad), jnp.float32),   # hidden (padded)
        ),
        grid=(),
        in_specs=[
            _full((n, n)),
            _full((n, d_pad)),
            _full((num_layers, d_pad, d_pad)),
            _full((num_layers, 1, d_pad)),
            _full((d_pad, c_pad)),
            _full((1, c_pad)),
        ],
        out_specs=(
            _full((n, c_pad)),
            _full((n, d_pad)),
        ),
    )(a_hat, x_p, packed["w"], packed["b"], packed["wz"], packed["bz"])

    # Strip lane padding.
    return z_p[:, :num_classes], h_p[:, :hidden]


# ---------------------------------- main ----------------------------------- #

if __name__ == "__main__":
    num_nodes = 16
    num_features = 8
    hidden = 32
    num_classes = 4
    num_layers1 = 2

    key = jax.random.PRNGKey(0)
    key, kx = jax.random.split(key)
    x = jax.random.normal(kx, (num_nodes, num_features), jnp.float32)

    # deterministic ring graph (bidirectional edges)
    idx = jnp.arange(num_nodes)
    src = jnp.concatenate([idx, (idx + 1) % num_nodes])
    dst = jnp.concatenate([(idx + 1) % num_nodes, idx])
    edge_index = jnp.stack([src, dst], axis=0)

    a_hat = build_normalized_adjacency(edge_index, num_nodes)
    params = init_params(key, num_features, hidden, num_classes, num_layers1)
    packed, hid, ncls = pack_params(params)

    z, h = net1_forward(packed, x, a_hat, hidden=hid, num_classes=ncls)
    jax.block_until_ready((z, h))

    assert z.shape == (num_nodes, num_classes)
    assert h.shape == (num_nodes, hidden)
    print("KERNEL_OK")
</pallas_src>

<mosaic_0001>
module attributes {stable_mosaic.version = 11 : i64} {
  func.func @_net1_fused_kernel(%arg0: memref<16x16xf32, #tpu.memory_space<vmem>>, %arg1: memref<16x128xf32, #tpu.memory_space<vmem>>, %arg2: memref<2x128x128xf32, #tpu.memory_space<vmem>>, %arg3: memref<2x1x128xf32, #tpu.memory_space<vmem>>, %arg4: memref<128x128xf32, #tpu.memory_space<vmem>>, %arg5: memref<1x128xf32, #tpu.memory_space<vmem>>, %arg6: memref<16x128xf32, #tpu.memory_space<vmem>>, %arg7: memref<16x128xf32, #tpu.memory_space<vmem>>) attributes {dimension_semantics = [], scalar_prefetch = 0 : i64, scratch_operands = 0 : i64, tpu.core_type = #tpu.core_type<tc>} {
    %c0 = arith.constant 0 : index
    %c0_0 = arith.constant 0 : index
    %0 = vector.load %arg0[%c0, %c0_0] : memref<16x16xf32, #tpu.memory_space<vmem>>, vector<16x16xf32>
    %c0_1 = arith.constant 0 : index
    %c0_2 = arith.constant 0 : index
    %1 = vector.load %arg1[%c0_1, %c0_2] : memref<16x128xf32, #tpu.memory_space<vmem>>, vector<16x128xf32>
    %cst = arith.constant dense<0.000000e+00> : vector<16x128xf32>
    %2 = tpu.matmul %0, %1, %cst {dimension_numbers = #tpu.dot_dimension_numbers<[1], [0], [0], [1], [0, 0, 1, 1], [], []>} : vector<16x16xf32>, vector<16x128xf32>, vector<16x128xf32> -> vector<16x128xf32>
    %c0_3 = arith.constant 0 : index
    %c0_4 = arith.constant 0 : index
    %c0_5 = arith.constant 0 : index
    %3 = vector.load %arg2[%c0_3, %c0_4, %c0_5] : memref<2x128x128xf32, #tpu.memory_space<vmem>>, vector<1x128x128xf32>
    %4 = vector.shape_cast %3 : vector<1x128x128xf32> to vector<128x128xf32>
    %cst_6 = arith.constant dense<0.000000e+00> : vector<16x128xf32>
    %5 = tpu.matmul %2, %4, %cst_6 {dimension_numbers = #tpu.dot_dimension_numbers<[1], [0], [0], [1], [0, 0, 1, 1], [], []>} : vector<16x128xf32>, vector<128x128xf32>, vector<16x128xf32> -> vector<16x128xf32>
    %c0_7 = arith.constant 0 : index
    %c0_8 = arith.constant 0 : index
    %c0_9 = arith.constant 0 : index
    %6 = vector.load %arg3[%c0_7, %c0_8, %c0_9] : memref<2x1x128xf32, #tpu.memory_space<vmem>>, vector<1x1x128xf32>
    %7 = vector.shape_cast %6 : vector<1x1x128xf32> to vector<1x128xf32>
    %8 = vector.broadcast %7 : vector<1x128xf32> to vector<16x128xf32>
    %9 = arith.addf %5, %8 : vector<16x128xf32>
    %cst_10 = arith.constant 0.000000e+00 : f32
    %10 = vector.broadcast %cst_10 : f32 to vector<16x128xf32>
    %11 = arith.maximumf %9, %10 : vector<16x128xf32>
    %cst_11 = arith.constant dense<0.000000e+00> : vector<16x128xf32>
    %12 = tpu.matmul %0, %11, %cst_11 {dimension_numbers = #tpu.dot_dimension_numbers<[1], [0], [0], [1], [0, 0, 1, 1], [], []>} : vector<16x16xf32>, vector<16x128xf32>, vector<16x128xf32> -> vector<16x128xf32>
    %c1 = arith.constant 1 : index
    %c0_12 = arith.constant 0 : index
    %c0_13 = arith.constant 0 : index
    %13 = vector.load %arg2[%c1, %c0_12, %c0_13] : memref<2x128x128xf32, #tpu.memory_space<vmem>>, vector<1x128x128xf32>
    %14 = vector.shape_cast %13 : vector<1x128x128xf32> to vector<128x128xf32>
    %cst_14 = arith.constant dense<0.000000e+00> : vector<16x128xf32>
    %15 = tpu.matmul %12, %14, %cst_14 {dimension_numbers = #tpu.dot_dimension_numbers<[1], [0], [0], [1], [0, 0, 1, 1], [], []>} : vector<16x128xf32>, vector<128x128xf32>, vector<16x128xf32> -> vector<16x128xf32>
    %c1_15 = arith.constant 1 : index
    %c0_16 = arith.constant 0 : index
    %c0_17 = arith.constant 0 : index
    %16 = vector.load %arg3[%c1_15, %c0_16, %c0_17] : memref<2x1x128xf32, #tpu.memory_space<vmem>>, vector<1x1x128xf32>
    %17 = vector.shape_cast %16 : vector<1x1x128xf32> to vector<1x128xf32>
    %18 = vector.broadcast %17 : vector<1x128xf32> to vector<16x128xf32>
    %19 = arith.addf %15, %18 : vector<16x128xf32>
    %cst_18 = arith.constant 0.000000e+00 : f32
    %20 = vector.broadcast %cst_18 : f32 to vector<16x128xf32>
    %21 = arith.maximumf %19, %20 : vector<16x128xf32>
    %c0_19 = arith.constant 0 : index
    %c0_20 = arith.constant 0 : index
    %22 = vector.load %arg7[%c0_19, %c0_20] : memref<16x128xf32, #tpu.memory_space<vmem>>, vector<16x128xf32>
    tpu.vector_store %arg7[%c0_19, %c0_20], %21 {strides = array<i32>} : memref<16x128xf32, #tpu.memory_space<vmem>>, vector<16x128xf32>,
    %c0_21 = arith.constant 0 : index
    %c0_22 = arith.constant 0 : index
    %23 = vector.load %arg4[%c0_21, %c0_22] : memref<128x128xf32, #tpu.memory_space<vmem>>, vector<128x128xf32>
    %cst_23 = arith.constant dense<0.000000e+00> : vector<16x128xf32>
    %24 = tpu.matmul %21, %23, %cst_23 {dimension_numbers = #tpu.dot_dimension_numbers<[1], [0], [0], [1], [0, 0, 1, 1], [], []>} : vector<16x128xf32>, vector<128x128xf32>, vector<16x128xf32> -> vector<16x128xf32>
    %c0_24 = arith.constant 0 : index
    %c0_25 = arith.constant 0 : index
    %25 = vector.load %arg5[%c0_24, %c0_25] : memref<1x128xf32, #tpu.memory_space<vmem>>, vector<1x128xf32>
    %26 = vector.broadcast %25 : vector<1x128xf32> to vector<16x128xf32>
    %27 = arith.addf %24, %26 : vector<16x128xf32>
    %c0_26 = arith.constant 0 : index
    %c0_27 = arith.constant 0 : index
    %28 = vector.load %arg6[%c0_26, %c0_27] : memref<16x128xf32, #tpu.memory_space<vmem>>, vector<16x128xf32>
    tpu.vector_store %arg6[%c0_26, %c0_27], %27 {strides = array<i32>} : memref<16x128xf32, #tpu.memory_space<vmem>>, vector<16x128xf32>,
    return
  }
}

</mosaic_0001>

<bundles_post_ra>
// kernel: net1_forward.1
= control target key start
LH: loop header
LB: loop body
LE: loop exit
PB: predicated region body
PF: predicated region fallthrough
CT: control target
= control target key end

     0   :  { %13 = vsyncpa [#allocation3], 0  ;;  %s1032_s0 = inlined_call_operand.vmem [shape: f32[16,16], index: 0, kind: input, shape index: {}]   ;;  %s1033_s1 = inlined_call_operand.vmem [shape: f32[16,128], index: 1, kind: input, shape index: {}]   ;;  %s1034_s2 = inlined_call_operand.hbm [shape: f32[2,128,128], index: 2, kind: input, shape index: {}]   ;;  %s1035_s3 = inlined_call_operand.vmem [shape: f32[2,1,128], index: 3, kind: input, shape index: {}]   ;;  %s1036_s4 = inlined_call_operand.hbm [shape: f32[128,128], index: 4, kind: input, shape index: {}]   ;;  %s1037_s5 = inlined_call_operand.vmem [shape: f32[1,128], index: 5, kind: input, shape index: {}]   ;;  %s1038_s6 = inlined_call_operand.vmem [shape: f32[16,128], index: 6, kind: output, shape index: {0}]   ;;  %s1039_s7 = inlined_call_operand.hbm [shape: f32[16,128], index: 7, kind: output, shape index: {1}]  }
   0x1   :  { %14 = vsyncpa [#allocation6], 0 }
   0x2   :  { %15 = vsyncpa [#allocation4], 0  ;;  %s911_s24 = smov [#allocation2]   ;;  %s839_s28 = scalar_lea.hbm %s1034_s2, 4096 }
   0x3   :  { %s25_s25 = sshll.u32 %s911_s24, 4  ;;  %p840_p0 = scmp.ne.s32.totalorder %s1034_s2, %s839_s28  ;;  %s26_s25 = int_to_ptr.vmem [resolvable:$true] %s25_s25 }
   0x4   :  { %p843_p1 = scmp.lt.u32.totalorder %s839_s28, %s1034_s2 }
   0x6   :  { %p845_p2 = pnand %p843_p1, %p840_p0 }
   0x8   :  { %848 = shalt.err (!%p845_p2)
}
   0x9   :  { %s849_s10 = scalar_lea.vmem %s26_s25, 4096  ;;  %p854_p4 = scmp.lt.s32.totalorder %s26_s25, %s26_s25 }
   0xa   :  { %p850_p3 = scmp.ne.s32.totalorder %s26_s25, %s849_s10  ;;  %p855_p5 = scmp.lt.s32.totalorder %s849_s10, %s849_s10 }
   0xc   :  { %p856_p6 = por %p855_p5, %p854_p4 }
   0xe   :  { %p857_p7 = pnand %p856_p6, %p850_p3 }
  0x10   :  { %860 = shalt.err (!%p857_p7)
}
  0x11   :  { %s912_s11 = smov 128   ;;  %s913_s12 = smov 8  }
  0x12   :  { %31 = dma.hbm_to_vmem [thread:$0]  %s1034_s2, 4096, %s26_s25, [#allocation3], %s912_s11, %s912_s11, %s913_s12  }
  0x13   :  { %s914_s15 = smov [#allocation5]   ;;  %s861_s19 = scalar_lea.hbm %s1036_s4, 2048 }
  0x14   :  { %s39_s16 = sshll.u32 %s914_s15, 4  ;;  %p862_p8 = scmp.ne.s32.totalorder %s1036_s4, %s861_s19  ;;  %s40_s16 = int_to_ptr.vmem [resolvable:$true] %s39_s16 }
  0x15   :  { %p865_p9 = scmp.lt.u32.totalorder %s861_s19, %s1036_s4 }
  0x17   :  { %p867_p10 = pnand %p865_p9, %p862_p8 }
  0x19   :  { %870 = shalt.err (!%p867_p10)
}
  0x1a   :  { %s871_s24 = scalar_lea.vmem %s40_s16, 2048  ;;  %p876_p12 = scmp.lt.s32.totalorder %s40_s16, %s40_s16 }
  0x1b   :  { %p872_p11 = scmp.ne.s32.totalorder %s40_s16, %s871_s24  ;;  %p877_p13 = scmp.lt.s32.totalorder %s871_s24, %s871_s24 }
  0x1d   :  { %p878_p0 = por %p877_p13, %p876_p12 }
  0x1f   :  { %p879_p1 = pnand %p878_p0, %p872_p11 }
  0x21   :  { %882 = shalt.err (!%p879_p1)
}
  0x22   :  { %45 = dma.hbm_to_vmem [thread:$0]  %s1036_s4, 2048, %s40_s16, [#allocation6], %s912_s11, %s912_s11, %s913_s12  }
  0x23   :  { %905 = dma.done.wait [#allocation3], 4096  }
  0x24   :  { %906 = vsyncadd [#allocation3], 4294963200 }
  0x25   :  { %907 = dma.done.wait [#allocation6], 2048  }
  0x26   :  { %908 = vsyncadd [#allocation6], 4294965248  ;;  %vm58_vm0 = vcmask 130048   ;;  %v56_v0 = vld [vmem:[%s1033_s1] sm:$0xff]  ;;  %v57_v1 = vld [vmem:[%s1033_s1 + $0x8] sm:$0xff]  ;;  %s915_s14 = smov [#allocation7]  }
  0x27   :  { %v54_v2 = vld [vmem:[%s1032_s0] sm:$0xff]  ;;  %v730_v3 = vpack.c.bf16 %v57_v1, %v56_v0  ;;  %v141_v5 = vld [vmem:[#allocation2 + $0x8] sm:$0xff]  ;;  %v142_v7 = vld [vmem:[#allocation2 + $0x10] sm:$0xff]  ;;  %s526_s15 = sshll.u32 %s915_s14, 4  ;;  %s527_s15 = int_to_ptr.vmem [resolvable:$true] %s526_s15 }
  0x28   :  { %615 = vmatprep.mubr.msk.f32.mxu0 %vm58_vm0, %v54_v2  ;;  %v140_v4 = vld [vmem:[#allocation2] sm:$0xff]  ;;  %v143_v8 = vld [vmem:[#allocation2 + $0x18] sm:$0xff]  ;;  %v145_v11 = vld [vmem:[#allocation2 + $0x28] sm:$0xff]  ;;  %s883_s16 = scalar_lea.vmem %s527_s15, 256  ;;  %p888_p3 = scmp.lt.s32.totalorder %s527_s15, %s527_s15 }
  0x29   :  { %v734_v6 = vpack.c.bf16 %v141_v5, %v140_v4  ;;  %731 = vmatprep.subr.bf16.mxu0 %v730_v3  ;;  %v738_v9 = vpack.c.bf16 %v143_v8, %v142_v7  ;;  %v144_v10 = vld [vmem:[#allocation2 + $0x20] sm:$0xff]  ;;  %v55_v12 = vld [vmem:[%s1032_s0 + $0x8] sm:$0xff]  ;;  %v146_v14 = vld [vmem:[#allocation2 + $0x30] sm:$0xff]  ;;  %p884_p2 = scmp.ne.s32.totalorder %s527_s15, %s883_s16  ;;  %p889_p4 = scmp.lt.s32.totalorder %s883_s16, %s883_s16 }
  0x2a   :  { %733 = vmatpush3.bf16.msra.mxu0 %v730_v3  ;;  %v742_v13 = vpack.c.bf16 %v145_v11, %v144_v10  ;;  %v147_v15 = vld [vmem:[#allocation2 + $0x38] sm:$0xff]  ;;  %v148_v17 = vld [vmem:[#allocation2 + $0x40] sm:$0xff]  ;;  %v149_v18 = vld [vmem:[#allocation2 + $0x48] sm:$0xff] }
  0x2b   :  { %735 = vmatprep.subr.bf16.mxu1 %v734_v6  ;;  %v746_v16 = vpack.c.bf16 %v147_v15, %v146_v14  ;;  %v750_v19 = vpack.c.bf16 %v149_v18, %v148_v17  ;;  %v150_v20 = vld [vmem:[#allocation2 + $0x50] sm:$0xff]  ;;  %v151_v21 = vld [vmem:[#allocation2 + $0x58] sm:$0xff]  ;;  %v152_v23 = vld [vmem:[#allocation2 + $0x60] sm:$0xff]  ;;  %p890_p5 = por %p889_p4, %p888_p3 }
  0x2c   :  { %737 = vmatpush3.bf16.msra.mxu1 %v734_v6  ;;  %v754_v22 = vpack.c.bf16 %v151_v21, %v150_v20  ;;  %v153_v24 = vld [vmem:[#allocation2 + $0x68] sm:$0xff]  ;;  %v154_v26 = vld [vmem:[#allocation2 + $0x70] sm:$0xff]  ;;  %v155_v27 = vld [vmem:[#allocation2 + $0x78] sm:$0xff] }
  0x2d   :  { %739 = vmatprep.subr.bf16.mxu1 %v738_v9  ;;  %616 = vmatmul.mubr.msk.f32.vlgmr.msra.gmra.mrb[0].mxu0 %vm58_vm0, %v55_v12  ;;  %v758_v25 = vpack.c.bf16 %v153_v24, %v152_v23  ;;  %v762_v28 = vpack.c.bf16 %v155_v27, %v154_v26  ;;  %v543_v31 = vld [vmem:[%s1035_s3] ss:$0 sm:$0xff]  ;;  %v317_v38 = vld [vmem:[#allocation2 + $0x88] sm:$0xff]  ;;  %v318_v42 = vld [vmem:[#allocation2 + $0x90] sm:$0xff]  ;;  %p891_p6 = pnand %p890_p5, %p884_p2 }
  0x2e   :  { %657 = vmatprep.mubr.msk.f32.mxu0 %vm58_vm0, %v54_v2  ;;  %v316_v37 = vld [vmem:[#allocation2 + $0x80] sm:$0xff]  ;;  %v319_v43 = vld [vmem:[#allocation2 + $0x98] sm:$0xff]  ;;  %v321_v46 = vld [vmem:[#allocation2 + $0xa8] sm:$0xff] }
  0x2f   :  { %v770_v41 = vpack.c.bf16 %v317_v38, %v316_v37  ;;  %v774_v44 = vpack.c.bf16 %v319_v43, %v318_v42  ;;  %v320_v45 = vld [vmem:[#allocation2 + $0xa0] sm:$0xff]  ;;  %v322_v48 = vld [vmem:[#allocation2 + $0xb0] sm:$0xff]  ;;  %v323_v49 = vld [vmem:[#allocation2 + $0xb8] sm:$0xff] }
  0x30   :  { %741 = vmatpush3.bf16.msra.mxu1 %v738_v9  ;;  %v778_v47 = vpack.c.bf16 %v321_v46, %v320_v45  ;;  %v782_v50 = vpack.c.bf16 %v323_v49, %v322_v48  ;;  %v324_v51 = vld [vmem:[#allocation2 + $0xc0] sm:$0xff]  ;;  %v325_v52 = vld [vmem:[#allocation2 + $0xc8] sm:$0xff]  ;;  %v326_v54 = vld [vmem:[#allocation2 + $0xd0] sm:$0xff] }
  0x31   :  { %743 = vmatprep.subr.bf16.mxu1 %v742_v13  ;;  %v786_v53 = vpack.c.bf16 %v325_v52, %v324_v51  ;;  %v327_v55 = vld [vmem:[#allocation2 + $0xd8] sm:$0xff]  ;;  %v328_v57 = vld [vmem:[#allocation2 + $0xe0] sm:$0xff]  ;;  %v329_v58 = vld [vmem:[#allocation2 + $0xe8] sm:$0xff] }
  0x32   :  { %v790_v56 = vpack.c.bf16 %v327_v55, %v326_v54  ;;  %v794_v59 = vpack.c.bf16 %v329_v58, %v328_v57  ;;  %v330_v60 = vld [vmem:[#allocation2 + $0xf0] sm:$0xff]  ;;  %v331_v61 = vld [vmem:[#allocation2 + $0xf8] sm:$0xff]  ;;  %v419_v63 = vld [vmem:[#allocation5] sm:$0xff] }
  0x33   :  { %v798_v62 = vpack.c.bf16 %v331_v61, %v330_v60  ;;  %v420_v0 = vld [vmem:[#allocation5 + $0x8] sm:$0xff]  ;;  %v421_v1 = vld [vmem:[#allocation5 + $0x10] sm:$0xff]  ;;  %v422_v3 = vld [vmem:[#allocation5 + $0x18] sm:$0xff] }
  0x34   :  { %745 = vmatpush3.bf16.msra.mxu1 %v742_v13  ;;  %v802_v2 = vpack.c.bf16 %v420_v0, %v419_v63  ;;  %v806_v4 = vpack.c.bf16 %v422_v3, %v421_v1  ;;  %v423_v5 = vld [vmem:[#allocation5 + $0x20] sm:$0xff]  ;;  %v424_v6 = vld [vmem:[#allocation5 + $0x28] sm:$0xff]  ;;  %v425_v8 = vld [vmem:[#allocation5 + $0x30] sm:$0xff] }
  0x35   :  { %747 = vmatprep.subr.bf16.mxu1 %v746_v16  ;;  %v810_v7 = vpack.c.bf16 %v424_v6, %v423_v5  ;;  %v426_v9 = vld [vmem:[#allocation5 + $0x38] sm:$0xff]  ;;  %v427_v11 = vld [vmem:[#allocation5 + $0x40] sm:$0xff]  ;;  %v429_v14 = vld [vmem:[#allocation5 + $0x50] sm:$0xff] }
  0x36   :  { %v814_v10 = vpack.c.bf16 %v426_v9, %v425_v8  ;;  %v430_v15 = vld [vmem:[#allocation5 + $0x58] sm:$0xff]  ;;  %v431_v17 = vld [vmem:[#allocation5 + $0x60] sm:$0xff]  ;;  %v432_v18 = vld [vmem:[#allocation5 + $0x68] sm:$0xff] }
  0x37   :  { %v434_v23 = vld [vmem:[#allocation5 + $0x78] sm:$0xff] }
  0x38   :  { %749 = vmatpush3.bf16.msra.mxu1 %v746_v16  ;;  %v822_v16 = vpack.c.bf16 %v430_v15, %v429_v14 }
  0x39   :  { %751 = vmatprep.subr.bf16.mxu1 %v750_v19 }
  0x3c   :  { %753 = vmatpush3.bf16.msra.mxu1 %v750_v19  ;;  %v826_v19 = vpack.c.bf16 %v432_v18, %v431_v17 }
  0x3d   :  { %755 = vmatprep.subr.bf16.mxu1 %v754_v22 }
  0x40   :  { %757 = vmatpush3.bf16.msra.mxu1 %v754_v22  ;;  %v433_v22 = vld [vmem:[#allocation5 + $0x70] sm:$0xff] }
  0x41   :  { %759 = vmatprep.subr.bf16.mxu1 %v758_v25  ;;  %v830_v24 = vpack.c.bf16 %v434_v23, %v433_v22 }
  0x44   :  { %761 = vmatpush3.bf16.msra.mxu1 %v758_v25  ;;  %v547_v25 = vld [vmem:[%s1035_s3 + $0x1] ss:$0 sm:$0xff] }
  0x45   :  { %763 = vmatprep.subr.bf16.mxu1 %v762_v28 }
  0x48   :  { %765 = vmatpush3.bf16.msra.mxu1 %v762_v28 }
  0x49   :  { %803 = vmatprep.subr.bf16.mxu1 %v802_v2 }
 0x100   :  { %v617_v29 = vpop.f32.mrb[0].mxu0 }
 0x101   :  { %v131_v30 = vpop.f32.mrb[1].mxu0 }
 0x102   :  { %650 = vmatprep.mubr.f32.mxu1 %v131_v30 }
 0x103   :  { %651 = vmatmul.mubr.f32.vlgmr.msra.gmra.mrb[0].mxu1 %v617_v29 }
 0x104   :  { %805 = vmatpush3.bf16.msra.mxu1 %v802_v2 }
 0x105   :  { %807 = vmatprep.subr.bf16.mxu1 %v806_v4 }
 0x108   :  { %809 = vmatpush3.bf16.msra.mxu1 %v806_v4 }
 0x109   :  { %811 = vmatprep.subr.bf16.mxu1 %v810_v7 }
 0x10c   :  { %813 = vmatpush3.bf16.msra.mxu1 %v810_v7 }
 0x10d   :  { %815 = vmatprep.subr.bf16.mxu1 %v814_v10 }
 0x110   :  { %817 = vmatpush3.bf16.msra.mxu1 %v814_v10 }
 0x1d6   :  { %v652_v32 = vpop.f32.mrb[0].mxu1 }
 0x1d7   :  { %v235_v33 = vadd.f32 %v652_v32, %v543_v31  ;;  %v229_v34 = vpop.f32.mrb[1].mxu1 }
 0x1d8   :  { %v230_v35 = vadd.f32 %v543_v31, %v229_v34 }
 0x1d9   :  { %v239_v36 = vmax.f32 %v235_v33, 0.0 }
 0x1da   :  { %v238_v39 = vmax.f32 %v230_v35, 0.0 }
 0x1dc   :  { %v766_v40 = vpack.c.bf16 %v239_v36, %v238_v39 }
 0x1de   :  { %767 = vmatprep.subr.bf16.mxu0 %v766_v40 }
 0x1df   :  { %769 = vmatpush3.bf16.msra.mxu0 %v766_v40 }
 0x1e0   :  { %771 = vmatprep.subr.bf16.mxu0 %v770_v41 }
 0x1e2   :  { %658 = vmatmul.mubr.msk.f32.vlgmr.msra.gmra.mrb[2].mxu0 %vm58_vm0, %v55_v12  ;;  %v428_v12 = vld [vmem:[#allocation5 + $0x48] sm:$0xff] }
 0x1e3   :  { %773 = vmatpush3.bf16.msra.mxu0 %v770_v41  ;;  %v818_v13 = vpack.c.bf16 %v428_v12, %v427_v11 }
 0x1e4   :  { %775 = vmatprep.subr.bf16.mxu0 %v774_v44 }
 0x1e5   :  { %819 = vmatprep.subr.bf16.mxu1 %v818_v13 }
 0x1e6   :  { %821 = vmatpush3.bf16.msra.mxu1 %v818_v13 }
 0x1e7   :  { %777 = vmatpush3.bf16.msra.mxu0 %v774_v44  ;;  %823 = vmatprep.subr.bf16.mxu1 %v822_v16 }
 0x1e8   :  { %779 = vmatprep.subr.bf16.mxu0 %v778_v47 }
 0x1ea   :  { %825 = vmatpush3.bf16.msra.mxu1 %v822_v16 }
 0x1eb   :  { %781 = vmatpush3.bf16.msra.mxu0 %v778_v47  ;;  %827 = vmatprep.subr.bf16.mxu1 %v826_v19 }
 0x1ec   :  { %783 = vmatprep.subr.bf16.mxu0 %v782_v50 }
 0x1ee   :  { %829 = vmatpush3.bf16.msra.mxu1 %v826_v19 }
 0x1ef   :  { %785 = vmatpush3.bf16.msra.mxu0 %v782_v50  ;;  %831 = vmatprep.subr.bf16.mxu1 %v830_v24 }
 0x1f0   :  { %787 = vmatprep.subr.bf16.mxu0 %v786_v53 }
 0x1f2   :  { %833 = vmatpush3.bf16.msra.mxu1 %v830_v24 }
 0x1f3   :  { %789 = vmatpush3.bf16.msra.mxu0 %v786_v53 }
 0x1f4   :  { %791 = vmatprep.subr.bf16.mxu0 %v790_v56 }
 0x1f7   :  { %793 = vmatpush3.bf16.msra.mxu0 %v790_v56 }
 0x1f8   :  { %795 = vmatprep.subr.bf16.mxu0 %v794_v59 }
 0x1fb   :  { %797 = vmatpush3.bf16.msra.mxu0 %v794_v59 }
 0x1fc   :  { %799 = vmatprep.subr.bf16.mxu0 %v798_v62 }
 0x1ff   :  { %801 = vmatpush3.bf16.msra.mxu0 %v798_v62 }
 0x2b5   :  { %v659_v20 = vpop.f32.mrb[2].mxu0 }
 0x2b6   :  { %v306_v21 = vpop.f32.mrb[3].mxu0 }
 0x2b7   :  { %692 = vmatprep.mubr.f32.mxu0 %v306_v21 }
 0x2b8   :  { %693 = vmatmul.mubr.f32.vlgmr.msra.gmra.mrb[4].mxu0 %v659_v20 }
 0x38b   :  { %v694_v26 = vpop.f32.mrb[4].mxu0 }
 0x38c   :  { %v412_v27 = vadd.f32 %v694_v26, %v547_v25  ;;  %v406_v28 = vpop.f32.mrb[5].mxu0 }
 0x38d   :  { %v407_v29 = vadd.f32 %v547_v25, %v406_v28 }
 0x38e   :  { %v416_v30 = vmax.f32 %v412_v27, 0.0 }
 0x38f   :  { %v415_v31 = vmax.f32 %v407_v29, 0.0 }
 0x390   :  { %418 = vst [vmem:[#allocation7 + $0x8] sm:$0xff] %v416_v30 }
 0x391   :  { %417 = vst [vmem:[#allocation7] sm:$0xff] %v415_v31  ;;  %727 = vmatprep.mubr.f32.mxu1 %v415_v31 }
 0x392   :  { %728 = vmatmul.mubr.f32.vlgmr.msra.gmra.mrb[2].mxu1 %v416_v30 }
 0x393   :  { %894 = shalt.err (!%p891_p6)
}
 0x394   :  { %s895_s18 = scalar_lea.hbm %s1039_s7, 256 }
 0x395   :  { %p896_p7 = scmp.ne.s32.totalorder %s1039_s7, %s895_s18  ;;  %p899_p8 = scmp.lt.u32.totalorder %s895_s18, %s1039_s7 }
 0x397   :  { %p901_p9 = pnand %p899_p8, %p896_p7 }
 0x399   :  { %904 = shalt.err (!%p901_p9)
}
 0x39a   :  { %532 = dma.vmem_to_hbm [thread:$0]  %s527_s15, 256, %s1039_s7, [#allocation4], %s912_s11, %s912_s11, %s913_s12  }
 0x39b   :  { %v548_v32 = vld [vmem:[%s1037_s5] ss:$0 sm:$0xff] }
 0x465   :  { %v729_v33 = vpop.f32.mrb[2].mxu1 }
 0x466   :  { %v514_v34 = vadd.f32 %v729_v33, %v548_v32  ;;  %v508_v35 = vpop.f32.mrb[3].mxu1 }
 0x467   :  { %v509_v36 = vadd.f32 %v548_v32, %v508_v35 }
 0x468   :  { %518 = vst [vmem:[%s1038_s6 + $0x8] sm:$0xff] %v514_v34 }
 0x469   :  { %517 = vst [vmem:[%s1038_s6] sm:$0xff] %v509_v36 }
 0x46a   :  { %909 = dma.done.wait [#allocation4], 256  }
 0x46b   :  { %910 = vsyncadd [#allocation4], 4294967040 }
 0x46c   :  { %538 = vsyncpa [#allocation3], 1 }
 0x46d   :  { %539 = vsyncpa [#allocation6], 1 }
 0x46e   :  { %540 = vsyncpa [#allocation4], 1 }

</bundles_post_ra>
